<compile_context>
chip_gen: v6e
topology: v6e:2x2x1
jax: 0.10.0
libtpu: 0.0.40
codegen_flags: <defaults>
</compile_context>

<pallas_src>
import functools

import jax
import jax.numpy as jnp
from jax import lax
from jax.experimental import pallas as pl
from jax.experimental.pallas import tpu as pltpu

BN_EPS = 1e-5


def _round_up(n, m):
    return ((n + m - 1) // m) * m


# ---------------------------------------------------------------------------
# Kernel 1: fold full-batch BatchNorm statistics into per-feature scale/shift.
# ---------------------------------------------------------------------------
def bn_stats_kernel(x_ref, w1_ref, b1_ref, gamma_ref, beta_ref,
                    scale_ref, shift_ref, sumx_ref, xtx_ref, *, batch_size):
    t = pl.program_id(0)

    @pl.when(t == 0)
    def _():
        sumx_ref[...] = jnp.zeros_like(sumx_ref)
        xtx_ref[...] = jnp.zeros_like(xtx_ref)

    # Batch-axis reductions on the MXU (not the XLU). Zero-padded batch rows
    # contribute nothing to either moment, so tiling/padding is exact.
    x = x_ref[...].astype(jnp.float32)
    ones_row = jnp.ones((1, x.shape[0]), jnp.float32)
    sumx_ref[...] += jnp.dot(ones_row, x, preferred_element_type=jnp.float32)
    xtx_ref[...] += lax.dot_general(
        x, x, dimension_numbers=(((0,), (0,)), ((), ())),
        preferred_element_type=jnp.float32)

    @pl.when(t == pl.num_programs(0) - 1)
    def _():
        inv_b = jnp.float32(1.0 / batch_size)
        w1 = w1_ref[...].astype(jnp.float32)                 # (inp, E)
        mean_x = sumx_ref[...] * inv_b                       # (1, inp)
        m2 = xtx_ref[...] * inv_b                            # (inp, inp) = E[x x^T]
        mxw = jnp.dot(mean_x, w1, preferred_element_type=jnp.float32)  # (1, E)
        mean_h = mxw + b1_ref[...]                           # mean of h = x@W1 + b1
        ones_in = jnp.ones((1, w1.shape[0]), jnp.float32)
        m2w = jnp.dot(m2, w1, preferred_element_type=jnp.float32)      # (inp, E)
        e2 = jnp.dot(ones_in, w1 * m2w, preferred_element_type=jnp.float32)
        var_h = jnp.maximum(e2 - mxw * mxw, 0.0)             # biased batch variance
        scale = gamma_ref[...] * lax.rsqrt(var_h + BN_EPS)
        scale_ref[...] = scale
        shift_ref[...] = beta_ref[...] - mean_h * scale


# ---------------------------------------------------------------------------
# Kernel 2: Linear1 -> folded BN affine -> ReLU -> Linear2 on one batch tile.
# ---------------------------------------------------------------------------
def classify_fwd_kernel(x_ref, w1_ref, b1_ref, scale_ref, shift_ref,
                        w2_ref, b2_ref, *out_refs):
    logits_ref = out_refs[0]
    h = jnp.dot(x_ref[...], w1_ref[...],
                preferred_element_type=jnp.float32) + b1_ref[...]
    h = h * scale_ref[...] + shift_ref[...]          # folded BatchNorm affine
    h = jnp.maximum(h, 0.0)                          # ReLU
    if len(out_refs) > 1:                            # embed only when requested
        out_refs[1][...] = h.astype(out_refs[1].dtype)
    logits_ref[...] = (jnp.dot(h.astype(w2_ref.dtype), w2_ref[...],
                               preferred_element_type=jnp.float32)
                       + b2_ref[...]).astype(logits_ref.dtype)


def classify_block(x, params, return_embed=False, *, block_rows=512,
                   compute_dtype=jnp.float32):
    """Pallas implementation of ClassifyBlock.forward (training-mode BN)."""
    # TODO(synk): BatchNorm1d running_mean/running_var buffer updates (training
    # bookkeeping) are not emitted; the forward output does not depend on them.
    w1, b1, gamma, beta, w2, b2 = params   # w1:(inp,E), w2:(E,C), pre-transposed
    B, inp = x.shape
    E = w1.shape[1]
    C = w2.shape[1]

    f32 = jnp.float32
    itemsize = jnp.dtype(compute_dtype).itemsize

    # Lane-dense padding for features/classes; sublane-friendly batch tiles.
    Ep = _round_up(E, 128)
    Cp = _round_up(C, 128)
    assert block_rows % 8 == 0
    Bt = min(block_rows, _round_up(B, 8))   # rows per tile (multiple of 8)
    Bp = _round_up(B, Bt)                   # padded batch (zero rows are inert)
    nbt = Bp // Bt

    xp = jnp.zeros((Bp, inp), compute_dtype).at[:B, :].set(x.astype(compute_dtype))
    w1p = jnp.zeros((inp, Ep), compute_dtype).at[:, :E].set(w1.astype(compute_dtype))
    b1p = jnp.zeros((1, Ep), f32).at[:, :E].set(jnp.reshape(b1, (1, E)))
    gp = jnp.zeros((1, Ep), f32).at[:, :E].set(jnp.reshape(gamma, (1, E)))
    btp = jnp.zeros((1, Ep), f32).at[:, :E].set(jnp.reshape(beta, (1, E)))
    w2p = jnp.zeros((Ep, Cp), compute_dtype).at[:E, :C].set(w2.astype(compute_dtype))
    b2p = jnp.zeros((1, Cp), f32).at[:, :C].set(jnp.reshape(b2, (1, C)))

    x_spec = pl.BlockSpec((Bt, inp), lambda t: (t, 0))
    w1_spec = pl.BlockSpec((inp, Ep), lambda t: (0, 0))
    row_spec = pl.BlockSpec((1, Ep), lambda t: (0, 0))

    # ---- pass 1: full-batch BN statistics (reduction over batch tiles) ----
    scale, shift = pl.pallas_call(
        functools.partial(bn_stats_kernel, batch_size=float(B)),
        out_shape=(jax.ShapeDtypeStruct((1, Ep), f32),
                   jax.ShapeDtypeStruct((1, Ep), f32)),
        grid=(nbt,),
        in_specs=[x_spec, w1_spec, row_spec, row_spec, row_spec],
        out_specs=(row_spec, row_spec),
        scratch_shapes=[pltpu.VMEM((1, inp), f32),
                        pltpu.VMEM((inp, inp), f32)],
        compiler_params=pltpu.CompilerParams(
            dimension_semantics=("arbitrary",)),
    )(xp, w1p, b1p, gp, btp)

    # ---- pass 2: Linear1 -> BN affine -> ReLU -> Linear2, batch-parallel ----
    out_shape = [jax.ShapeDtypeStruct((Bp, Cp), f32)]
    out_specs = [pl.BlockSpec((Bt, Cp), lambda t: (t, 0))]
    if return_embed:
        out_shape.append(jax.ShapeDtypeStruct((Bp, Ep), f32))
        out_specs.append(pl.BlockSpec((Bt, Ep), lambda t: (t, 0)))

    flops = 2 * Bp * (inp * Ep + Ep * Cp)
    bytes_accessed = (Bp * inp * itemsize + inp * Ep * itemsize
                      + Ep * Cp * itemsize + 3 * Ep * 4 + Cp * 4
                      + Bp * Cp * 4 + (Bp * Ep * 4 if return_embed else 0))

    outs = pl.pallas_call(
        classify_fwd_kernel,
        out_shape=tuple(out_shape),
        grid=(nbt,),
        in_specs=[x_spec, w1_spec, row_spec, row_spec, row_spec,
                  pl.BlockSpec((Ep, Cp), lambda t: (0, 0)),
                  pl.BlockSpec((1, Cp), lambda t: (0, 0))],
        out_specs=tuple(out_specs),
        compiler_params=pltpu.CompilerParams(
            dimension_semantics=("parallel",)),
        cost_estimate=pl.CostEstimate(flops=flops, transcendentals=0,
                                      bytes_accessed=bytes_accessed),
    )(xp, w1p, b1p, scale, shift, w2p, b2p)

    logits = outs[0][:B, :C]
    if return_embed:
        return outs[1][:B, :E], logits
    return logits


def init_params(key, inp_dim, num_cls, embed_dim):
    """Deterministic synthetic parameters (shapes match nn.Linear / nn.BatchNorm1d)."""
    k1, k2, k3, k4 = jax.random.split(key, 4)
    bound1 = 1.0 / jnp.sqrt(inp_dim)
    w1 = jax.random.uniform(k1, (inp_dim, embed_dim), jnp.float32, -bound1, bound1)
    b1 = jax.random.uniform(k2, (1, embed_dim), jnp.float32, -bound1, bound1)
    gamma = jnp.ones((1, embed_dim), jnp.float32)   # BatchNorm1d weight
    beta = jnp.zeros((1, embed_dim), jnp.float32)   # BatchNorm1d bias
    bound2 = 1.0 / jnp.sqrt(embed_dim)
    w2 = jax.random.uniform(k3, (embed_dim, num_cls), jnp.float32, -bound2, bound2)
    b2 = jax.random.uniform(k4, (1, num_cls), jnp.float32, -bound2, bound2)
    return (w1, b1, gamma, beta, w2, b2)


def reference(x, params):
    """Pure-JAX reference of the PyTorch forward (training-mode BN)."""
    w1, b1, gamma, beta, w2, b2 = params
    h = x @ w1 + b1
    mean = jnp.mean(h, axis=0, keepdims=True)
    var = jnp.mean((h - mean) ** 2, axis=0, keepdims=True)
    h = (h - mean) / jnp.sqrt(var + BN_EPS) * gamma + beta
    h = jnp.maximum(h, 0.0)
    return h, h @ w2 + b2


if __name__ == "__main__":
    key = jax.random.PRNGKey(0)
    kx, kp = jax.random.split(key)

    batch, inp_dim, embed_dim, num_cls = 20, 32, 128, 10
    x = jax.random.normal(kx, (batch, inp_dim), jnp.float32)
    params = init_params(kp, inp_dim, num_cls, embed_dim)

    # Small block_rows so the demo exercises the batch grid (batch 20 padded to
    # 24 -> 3 tiles of 8 rows) and the lane-dense class padding (10 -> 128).
    embed, logits = classify_block(x, params, return_embed=True, block_rows=8)
    logits_only = classify_block(x, params, return_embed=False, block_rows=8)
    jax.block_until_ready((embed, logits, logits_only))

    ref_embed, ref_logits = reference(x, params)
    assert jnp.allclose(embed, ref_embed, atol=1e-4, rtol=1e-4)
    assert jnp.allclose(logits, ref_logits, atol=1e-4, rtol=1e-4)
    assert jnp.allclose(logits_only, ref_logits, atol=1e-4, rtol=1e-4)

    # bf16 MXU operands (f32 accumulation): looser tolerance vs the f32 reference.
    logits_bf16 = classify_block(x, params, return_embed=False, block_rows=8,
                                 compute_dtype=jnp.bfloat16)
    jax.block_until_ready(logits_bf16)
    assert jnp.allclose(logits_bf16, ref_logits, atol=5e-2, rtol=5e-2)

    print("KERNEL_OK")
</pallas_src>

<mosaic_0001>
module attributes {stable_mosaic.version = 11 : i64} {
  func.func @bn_stats_kernel(%arg0: i32, %arg1: memref<8x32xf32, #tpu.memory_space<vmem>>, %arg2: memref<32x128xf32, #tpu.memory_space<vmem>>, %arg3: memref<1x128xf32, #tpu.memory_space<vmem>>, %arg4: memref<1x128xf32, #tpu.memory_space<vmem>>, %arg5: memref<1x128xf32, #tpu.memory_space<vmem>>, %arg6: memref<1x128xf32, #tpu.memory_space<vmem>>, %arg7: memref<1x128xf32, #tpu.memory_space<vmem>>, %arg8: memref<1x32xf32, #tpu.memory_space<vmem>>, %arg9: memref<32x32xf32, #tpu.memory_space<vmem>>) attributes {dimension_semantics = [#tpu.dimension_semantics<arbitrary>], iteration_bounds = array<i64: 3>, scalar_prefetch = 0 : i64, scratch_operands = 2 : i64, tpu.core_type = #tpu.core_type<tc>, window_params = [{transform_indices = @transform_0, window_bounds = array<i64: 8, 32>}, {pipeline_mode = #tpu.pipeline_mode<synchronous>, transform_indices = @transform_1, window_bounds = array<i64: 32, 128>}, {pipeline_mode = #tpu.pipeline_mode<synchronous>, transform_indices = @transform_2, window_bounds = array<i64: 1, 128>}, {pipeline_mode = #tpu.pipeline_mode<synchronous>, transform_indices = @transform_3, window_bounds = array<i64: 1, 128>}, {pipeline_mode = #tpu.pipeline_mode<synchronous>, transform_indices = @transform_4, window_bounds = array<i64: 1, 128>}, {pipeline_mode = #tpu.pipeline_mode<synchronous>, transform_indices = @transform_5, window_bounds = array<i64: 1, 128>}, {pipeline_mode = #tpu.pipeline_mode<synchronous>, transform_indices = @transform_6, window_bounds = array<i64: 1, 128>}]} {
    %c0_i32 = arith.constant 0 : i32
    %0 = arith.cmpi eq, %arg0, %c0_i32 : i32
    %1 = arith.extui %0 : i1 to i32
    %c0_i32_0 = arith.constant 0 : i32
    %2 = arith.cmpi ne, %1, %c0_i32_0 : i32
    scf.if %2 {
      %cst_13 = arith.constant 0.000000e+00 : f32
      %16 = vector.broadcast %cst_13 : f32 to vector<1x32xf32>
      %c0_14 = arith.constant 0 : index
      %c0_15 = arith.constant 0 : index
      %17 = vector.load %arg8[%c0_14, %c0_15] : memref<1x32xf32, #tpu.memory_space<vmem>>, vector<1x32xf32>
      tpu.vector_store %arg8[%c0_14, %c0_15], %16 {strides = array<i32>} : memref<1x32xf32, #tpu.memory_space<vmem>>, vector<1x32xf32>,
      %cst_16 = arith.constant 0.000000e+00 : f32
      %18 = vector.broadcast %cst_16 : f32 to vector<32x32xf32>
      %c0_17 = arith.constant 0 : index
      %c0_18 = arith.constant 0 : index
      %19 = vector.load %arg9[%c0_17, %c0_18] : memref<32x32xf32, #tpu.memory_space<vmem>>, vector<32x32xf32>
      tpu.vector_store %arg9[%c0_17, %c0_18], %18 {strides = array<i32>} : memref<32x32xf32, #tpu.memory_space<vmem>>, vector<32x32xf32>,
    } else {
    }
    %c0 = arith.constant 0 : index
    %c0_1 = arith.constant 0 : index
    %3 = vector.load %arg1[%c0, %c0_1] : memref<8x32xf32, #tpu.memory_space<vmem>>, vector<8x32xf32>
    %cst = arith.constant 1.000000e+00 : f32
    %4 = vector.broadcast %cst : f32 to vector<1x8xf32>
    %c0_2 = arith.constant 0 : index
    %c0_3 = arith.constant 0 : index
    %5 = vector.load %arg8[%c0_2, %c0_3] : memref<1x32xf32, #tpu.memory_space<vmem>>, vector<1x32xf32>
    %cst_4 = arith.constant dense<0.000000e+00> : vector<1x32xf32>
    %6 = tpu.matmul %4, %3, %cst_4 {dimension_numbers = #tpu.dot_dimension_numbers<[1], [0], [0], [1], [0, 0, 1, 1], [], []>} : vector<1x8xf32>, vector<8x32xf32>, vector<1x32xf32> -> vector<1x32xf32>
    %7 = arith.addf %5, %6 : vector<1x32xf32>
    %c0_5 = arith.constant 0 : index
    %c0_6 = arith.constant 0 : index
    %8 = vector.load %arg8[%c0_5, %c0_6] : memref<1x32xf32, #tpu.memory_space<vmem>>, vector<1x32xf32>
    tpu.vector_store %arg8[%c0_5, %c0_6], %7 {strides = array<i32>} : memref<1x32xf32, #tpu.memory_space<vmem>>, vector<1x32xf32>,
    %c0_7 = arith.constant 0 : index
    %c0_8 = arith.constant 0 : index
    %9 = vector.load %arg9[%c0_7, %c0_8] : memref<32x32xf32, #tpu.memory_space<vmem>>, vector<32x32xf32>
    %cst_9 = arith.constant dense<0.000000e+00> : vector<32x32xf32>
    %10 = tpu.matmul %3, %3, %cst_9 {dimension_numbers = #tpu.dot_dimension_numbers<[0], [0], [1], [1], [0, 1, 1, 1], [], []>} : vector<8x32xf32>, vector<8x32xf32>, vector<32x32xf32> -> vector<32x32xf32>
    %11 = arith.addf %9, %10 : vector<32x32xf32>
    %c0_10 = arith.constant 0 : index
    %c0_11 = arith.constant 0 : index
    %12 = vector.load %arg9[%c0_10, %c0_11] : memref<32x32xf32, #tpu.memory_space<vmem>>, vector<32x32xf32>
    tpu.vector_store %arg9[%c0_10, %c0_11], %11 {strides = array<i32>} : memref<32x32xf32, #tpu.memory_space<vmem>>, vector<32x32xf32>,
    %c2_i32 = arith.constant 2 : i32
    %13 = arith.cmpi eq, %arg0, %c2_i32 : i32
    %14 = arith.extui %13 : i1 to i32
    %c0_i32_12 = arith.constant 0 : i32
    %15 = arith.cmpi ne, %14, %c0_i32_12 : i32
    scf.if %15 {
      %c0_13 = arith.constant 0 : index
      %c0_14 = arith.constant 0 : index
      %16 = vector.load %arg2[%c0_13, %c0_14] : memref<32x128xf32, #tpu.memory_space<vmem>>, vector<32x128xf32>
      %c0_15 = arith.constant 0 : index
      %c0_16 = arith.constant 0 : index
      %17 = vector.load %arg8[%c0_15, %c0_16] : memref<1x32xf32, #tpu.memory_space<vmem>>, vector<1x32xf32>
      %cst_17 = arith.constant 5.000000e-02 : f32
      %18 = vector.broadcast %cst_17 : f32 to vector<1x32xf32>
      %19 = arith.mulf %17, %18 : vector<1x32xf32>
      %c0_18 = arith.constant 0 : index
      %c0_19 = arith.constant 0 : index
      %20 = vector.load %arg9[%c0_18, %c0_19] : memref<32x32xf32, #tpu.memory_space<vmem>>, vector<32x32xf32>
      %cst_20 = arith.constant 5.000000e-02 : f32
      %21 = vector.broadcast %cst_20 : f32 to vector<32x32xf32>
      %22 = arith.mulf %20, %21 : vector<32x32xf32>
      %cst_21 = arith.constant dense<0.000000e+00> : vector<1x128xf32>
      %23 = tpu.matmul %19, %16, %cst_21 {dimension_numbers = #tpu.dot_dimension_numbers<[1], [0], [0], [1], [0, 0, 1, 1], [], []>} : vector<1x32xf32>, vector<32x128xf32>, vector<1x128xf32> -> vector<1x128xf32>
      %c0_22 = arith.constant 0 : index
      %c0_23 = arith.constant 0 : index
      %24 = vector.load %arg3[%c0_22, %c0_23] : memref<1x128xf32, #tpu.memory_space<vmem>>, vector<1x128xf32>
      %25 = arith.addf %23, %24 : vector<1x128xf32>
      %cst_24 = arith.constant 1.000000e+00 : f32
      %26 = vector.broadcast %cst_24 : f32 to vector<1x32xf32>
      %cst_25 = arith.constant dense<0.000000e+00> : vector<32x128xf32>
      %27 = tpu.matmul %22, %16, %cst_25 {dimension_numbers = #tpu.dot_dimension_numbers<[1], [0], [0], [1], [0, 0, 1, 1], [], []>} : vector<32x32xf32>, vector<32x128xf32>, vector<32x128xf32> -> vector<32x128xf32>
      %28 = arith.mulf %16, %27 : vector<32x128xf32>
      %cst_26 = arith.constant dense<0.000000e+00> : vector<1x128xf32>
      %29 = tpu.matmul %26, %28, %cst_26 {dimension_numbers = #tpu.dot_dimension_numbers<[1], [0], [0], [1], [0, 0, 1, 1], [], []>} : vector<1x32xf32>, vector<32x128xf32>, vector<1x128xf32> -> vector<1x128xf32>
      %30 = arith.mulf %23, %23 : vector<1x128xf32>
      %31 = arith.subf %29, %30 : vector<1x128xf32>
      %cst_27 = arith.constant 0.000000e+00 : f32
      %32 = vector.broadcast %cst_27 : f32 to vector<1x128xf32>
      %33 = arith.maximumf %31, %32 : vector<1x128xf32>
      %c0_28 = arith.constant 0 : index
      %c0_29 = arith.constant 0 : index
      %34 = vector.load %arg4[%c0_28, %c0_29] : memref<1x128xf32, #tpu.memory_space<vmem>>, vector<1x128xf32>
      %cst_30 = arith.constant 9.99999974E-6 : f32
      %35 = vector.broadcast %cst_30 : f32 to vector<1x128xf32>
      %36 = arith.addf %33, %35 : vector<1x128xf32>
      %37 = math.rsqrt %36 : vector<1x128xf32>
      %38 = arith.mulf %34, %37 : vector<1x128xf32>
      %c0_31 = arith.constant 0 : index
      %c0_32 = arith.constant 0 : index
      %39 = vector.load %arg6[%c0_31, %c0_32] : memref<1x128xf32, #tpu.memory_space<vmem>>, vector<1x128xf32>
      tpu.vector_store %arg6[%c0_31, %c0_32], %38 {strides = array<i32>} : memref<1x128xf32, #tpu.memory_space<vmem>>, vector<1x128xf32>,
      %c0_33 = arith.constant 0 : index
      %c0_34 = arith.constant 0 : index
      %40 = vector.load %arg5[%c0_33, %c0_34] : memref<1x128xf32, #tpu.memory_space<vmem>>, vector<1x128xf32>
      %41 = arith.mulf %25, %38 : vector<1x128xf32>
      %42 = arith.subf %40, %41 : vector<1x128xf32>
      %c0_35 = arith.constant 0 : index
      %c0_36 = arith.constant 0 : index
      %43 = vector.load %arg7[%c0_35, %c0_36] : memref<1x128xf32, #tpu.memory_space<vmem>>, vector<1x128xf32>
      tpu.vector_store %arg7[%c0_35, %c0_36], %42 {strides = array<i32>} : memref<1x128xf32, #tpu.memory_space<vmem>>, vector<1x128xf32>,
    } else {
    }
    return
  }
  func.func @transform_0(%arg0: i32) -> (i32, i32) {
    %c0_i32 = arith.constant 0 : i32
    %c0_i32_0 = arith.constant 0 : i32
    return %arg0, %c0_i32 : i32, i32
  }
  func.func @transform_1(%arg0: i32) -> (i32, i32) {
    %c0_i32 = arith.constant 0 : i32
    %c0_i32_0 = arith.constant 0 : i32
    %c0_i32_1 = arith.constant 0 : i32
    return %c0_i32, %c0_i32_0 : i32, i32
  }
  func.func @transform_2(%arg0: i32) -> (i32, i32) {
    %c0_i32 = arith.constant 0 : i32
    %c0_i32_0 = arith.constant 0 : i32
    %c0_i32_1 = arith.constant 0 : i32
    return %c0_i32, %c0_i32_0 : i32, i32
  }
  func.func @transform_3(%arg0: i32) -> (i32, i32) {
    %c0_i32 = arith.constant 0 : i32
    %c0_i32_0 = arith.constant 0 : i32
    %c0_i32_1 = arith.constant 0 : i32
    return %c0_i32, %c0_i32_0 : i32, i32
  }
  func.func @transform_4(%arg0: i32) -> (i32, i32) {
    %c0_i32 = arith.constant 0 : i32
    %c0_i32_0 = arith.constant 0 : i32
    %c0_i32_1 = arith.constant 0 : i32
    return %c0_i32, %c0_i32_0 : i32, i32
  }
  func.func @transform_5(%arg0: i32) -> (i32, i32) {
    %c0_i32 = arith.constant 0 : i32
    %c0_i32_0 = arith.constant 0 : i32
    %c0_i32_1 = arith.constant 0 : i32
    return %c0_i32, %c0_i32_0 : i32, i32
  }
  func.func @transform_6(%arg0: i32) -> (i32, i32) {
    %c0_i32 = arith.constant 0 : i32
    %c0_i32_0 = arith.constant 0 : i32
    %c0_i32_1 = arith.constant 0 : i32
    return %c0_i32, %c0_i32_0 : i32, i32
  }
}

</mosaic_0001>

<bundles_post_ra>
// kernel: tpu_custom_call.1
= control target key start
LH: loop header
LB: loop body
LE: loop exit
PB: predicated region body
PF: predicated region fallthrough
CT: control target
= control target key end

     0   :  { %12 = vsyncpa [#allocation5], 0  ;;  %s1401_s0 = inlined_call_operand.hbm [shape: f32[24,32], index: 0, kind: input, shape index: {}]   ;;  %s1402_s1 = inlined_call_operand.hbm [shape: f32[32,128], index: 1, kind: input, shape index: {}]   ;;  %s1403_s2 = inlined_call_operand.vmem [shape: f32[1,128], index: 2, kind: input, shape index: {}]   ;;  %s1404_s3 = inlined_call_operand.vmem [shape: f32[1,128], index: 3, kind: input, shape index: {}]   ;;  %s1405_s4 = inlined_call_operand.vmem [shape: f32[1,128], index: 4, kind: input, shape index: {}]   ;;  %s1406_s5 = inlined_call_operand.hbm [shape: f32[1,128], index: 5, kind: output, shape index: {0}]   ;;  %s1407_s6 = inlined_call_operand.hbm [shape: f32[1,128], index: 6, kind: output, shape index: {1}]  }
   0x1   :  { %14 = vsyncpa [#allocation5 + $0x1], 0 }
   0x2   :  { %15 = vsyncpa [#allocation8], 0 }
   0x3   :  { %16 = vsyncpa [#allocation6], 0 }
   0x4   :  { %17 = vsyncpa [#allocation11], 0  ;;  %s1243_s21 = smov 0   ;;  %s1245_s22 = smov 0  }
   0x5   :  { %s1247_s23 = smov 0   ;;  %s1249_s24 = smov 0  }
   0x6 LB: > { %s1262_s25 = sadd.s32 4294967295, %s1193_s24   ;;  %p43_p0 = scmp.ne.s32.totalorder %s1185_s22, %s1181_s21  ;;  %s1193_s24 = sphi %s1249_s24, %s1423_s24   ;;  %s1189_s23 = sphi %s1247_s23, %s1422_s23   ;;  %s1185_s22 = sphi %s1245_s22, %s1421_s22   ;;  %s1181_s21 = sphi %s1243_s21, %s1420_s21  }
   0x7   : > { %p1408_p1 = scmp.eq.s32.totalorder %s1262_s25, 0  ;;  %p869_p2 = scmp.ge.s32.totalorder %s1193_s24, 1 }
   0x8   : > { %p180_p3 = scmp.lt.s32.totalorder %s1193_s24, 4  ;;  %s1195_s28 = smov [#allocation7]  }
   0x9   : > { %p1271_p5 = por %p1408_p1, %p43_p0  ;;  %s192_s29 = sshll.u32 %s1195_s28, 4  ;;  %s193_s29 = int_to_ptr.vmem [resolvable:$true] %s192_s29 }
   0xa   : > { %p1275_p6 = pnand %p869_p2, %p180_p3  ;;  %s1288_s7 = sadd.s32 1, %s1193_s24  }
   0xb   : > { %s1411_s26 = scalar_select %p1271_p5, 1, 0 }
   0xc   : > { %s1412_s27 = scalar_select %p1275_p6, 1, 0 }
   0xd   : > { %p984_p7 = pneg %p1275_p6  ;;  %s30_s8 = sadd.s32 1, %s1189_s23 }
   0xe   : > { %s27_s9 = ssub.s32 %s1193_s24, %s1288_s7  ;;  %s1056_s10 = scalar_lea.vmem %s193_s29, 512 }
   0xf   : > { %p1283_p8 = pnand %p984_p7, %p1408_p1  ;;  %p1057_p10 = scmp.ne.s32.totalorder %s193_s29, %s1056_s10 }
  0x10   : > { %p1064_p13 = scmp.lt.s32.totalorder %s193_s29, %s193_s29  ;;  %p1065_p0 = scmp.lt.s32.totalorder %s1056_s10, %s1056_s10 }
  0x11   : > { %p1047_p9 = pneg %p1283_p8 }
  0x12   : > { %p1066_p2 = por %p1065_p0, %p1064_p13 }
  0x13   : > { %p1059_p11 = pnand %p1057_p10, %p1047_p9 }
  0x15   : > { %p1060_p12 = pneg %p1059_p11 }
  0x17   : > { %p1067_p3 = pnand %p1066_p2, %p1060_p12 }
  0x19   : > { %1070 = shalt.err (!%p1067_p3)
}
  0x1a   : > { %s1196_s11 = smov 128   ;;  %s1197_s12 = smov 8  }
  0x1b   : > { %987 = dma.hbm_to_vmem [thread:$0]  (!%p1283_p8), %s1402_s1, 512, %s193_s29, [#allocation8], %s1196_s11, %s1196_s11, %s1197_s12  }
  0x1c   : > { %p28_p7 = scmp.eq.s32.totalorder %s27_s9, 0  ;;  %p37_p9 = scmp.ne.s32.totalorder %s1189_s23, %s1185_s22 }
  0x1d   : > { %p38_p10 = scmp.eq.s32.totalorder %s1193_s24, 0  ;;  %p993_p11 = scmp.lt.s32.totalorder %s1193_s24, 3 }
  0x1e   : > { %s1305_s15 = scalar_select %p28_p7, %s1189_s23, %s30_s8  }
  0x1f   : > { %p39_p12 = por %p38_p10, %p37_p9  ;;  %s215_s16 = sand.u32 1, %s1189_s23  }
  0x20   : > { %s872_s17 = sshll.u32 %s215_s16, 3  ;;  %s873_s18 = sshll.u32 %s1193_s24, 7 }
  0x21   : > { %s1312_s21 = scalar_lea.hbm %s1401_s0, %s873_s18  ;;  %s219_s28 = scalar_lea.vmem [#allocation4], %s872_s17 }
  0x22   : > { %s226_s29 = sshll.u32 %s219_s28, 4  ;;  %p1314_p8 = pnand %p993_p11, %p39_p12  ;;  %s227_s29 = int_to_ptr.vmem [resolvable:$true] %s226_s29 }
  0x23   : > { %s216_s8 = scalar_lea.sflag [#allocation5], %s215_s16  ;;  %s1071_s9 = scalar_lea.hbm %s1312_s21, 128 }
  0x24   : > { %p1072_p13 = scmp.ne.s32.totalorder %s1312_s21, %s1071_s9  ;;  %p1073_p0 = pneg %p1314_p8 }
  0x25   : > { %s1076_s11 = scalar_lea.hbm %s1401_s0, 384  ;;  %p1077_p7 = scmp.lt.s32.totalorder %s1312_s21, %s1401_s0 }
  0x26   : > { %p1074_p2 = pnand %p1073_p0, %p1072_p13  ;;  %p1078_p9 = scmp.lt.s32.totalorder %s1076_s11, %s1071_s9 }
  0x28   : > { %p1075_p3 = pneg %p1074_p2  ;;  %p1079_p10 = por %p1078_p9, %p1077_p7 }
  0x2a   : > { %p1080_p11 = pnand %p1079_p10, %p1075_p3 }
  0x2c   : > { %1083 = shalt.err (!%p1080_p11)
}
  0x2d   : > { %s1084_s14 = scalar_lea.vmem %s227_s29, 128  ;;  %s1198_s16 = smov [#allocation4]  }
  0x2e   : > { %p1085_p12 = scmp.ne.s32.totalorder %s227_s29, %s1084_s14  ;;  %s1089_s17 = sshll.u32 %s1198_s16, 4  ;;  %s1090_s17 = int_to_ptr.vmem [resolvable:$false] %s1089_s17 }
  0x2f   : > { %s1091_s18 = scalar_lea.vmem %s1090_s17, 256  ;;  %p1092_p13 = scmp.lt.s32.totalorder %s227_s29, %s1090_s17 }
  0x30   : > { %p1087_p4 = pnand %p1085_p12, %p1073_p0  ;;  %p1093_p2 = scmp.lt.s32.totalorder %s1091_s18, %s1084_s14 }
  0x32   : > { %p1088_p1 = pneg %p1087_p4  ;;  %p1094_p5 = por %p1093_p2, %p1092_p13 }
  0x34   : > { %p1095_p6 = pnand %p1094_p5, %p1088_p1 }
  0x36   : > { %1098 = shalt.err (!%p1095_p6)
}
  0x37   : > { %991 = dma.hbm_to_vmem [thread:$0]  (!%p1314_p8), %s1312_s21, 128, %s227_s29, %s216_s8  }
  0x38   : > { %p1415_p3 = scmp.ne.s32.totalorder %s1412_s27, 0 }
  0x39   : > { %s237_s19 = sand.u32 (!%p1415_p3), 1, %s1185_s22   ;;  %p1416_p4 = scmp.ne.s32.totalorder (!%p1415_p3), %s1411_s26, 0 }
  0x3a   : > { %235 = sbr.rel (%p1415_p3) target bundleno = 877 (0x36d), region = 40  ;;  %s875_s20 = sshll.u32 (!%p1415_p3), %s237_s19, 3 }
  0x3b   : > { %s238_s28 = scalar_lea.sflag (!%p1415_p3), [#allocation5], %s237_s19  ;;  %s241_s9 = scalar_lea.vmem (!%p1415_p3), [#allocation4], %s875_s20 }
  0x3f   : > { %1164 = dma.done.wait (%p1416_p4), %s238_s28, 128  }
  0x40   : > { %1166 = vsyncadd (%p1416_p4), %s238_s28, 4294967168  ;;  %p1417_p1 = scmp.eq.s32.totalorder %s1262_s25, 0 }
  0x42   : > { %1168 = dma.done.wait (%p1417_p1), [#allocation8], 512   ;;  %p1418_p5 = pmov %p1417_p1 }
  0x43   : > { %p1419_p6 = scmp.ne.s32.totalorder %s1262_s25, 0 }
  0x44   : > { %1170 = vsyncadd (%p1418_p5), [#allocation8], 4294966784 }
  0x45   : > { %272 = sbr.rel (%p1419_p6) target bundleno = 78 (0x4e), region = 52 }
  0x4a   : > { %vm273_vm0 = vcmask 253952   ;;  %vm275_vm1 = vcmask 261120   ;;  %v1199_v0 = vmov 0.0  }
  0x4b   : > { %274 = vst.msk [vmem:[#allocation2] sm:$0x1] %vm273_vm0, %v1199_v0 }
  0x4c   : > { %276 = vst.msk [vmem:[#allocation3] sm:$0xff] %vm275_vm1, %v1199_v0  ;;  %277 = vst.msk [vmem:[#allocation3 + $0x8] sm:$0xff] %vm275_vm1, %v1199_v0 }
  0x4d   : > { %278 = vst.msk [vmem:[#allocation3 + $0x10] sm:$0xff] %vm275_vm1, %v1199_v0  ;;  %279 = vst.msk [vmem:[#allocation3 + $0x18] sm:$0xff] %vm275_vm1, %v1199_v0 }
  0x4e PF: > { %v280_v1 = vld [vmem:[%s241_s9] sm:$0xff]  ;;  %v1200_v2 = vmov 0.0   ;;  %vm1201_vm2 = vmmov 0   ;;  %vm282_vm3 = vcmask 64512   ;;  %v1202_v3 = vmov 1.0   ;;  %p883_p8 = scmp.ne.s32.totalorder %s1262_s25, 2 }
  0x4f   : > { %363 = vxpose.xlu0.b32.start.end [1/1] (short) (narrow) %v280_v1, 32  ;;  %926 = vmatprep.subr.mxu1 %v280_v1  ;;  %vm357_vm4 = vcmask 253952   ;;  %vm496_vm5 = vcmask 261120  }
  0x50   : > { %927 = vmatpush3.msra.mxu1 %v280_v1  ;;  %921 = vmatprep.subr.mxu0 %v1200_v2 }
  0x51   : > { %923 = vmatprep.mubr.msk.f32.mxu0 %vm1201_vm2, %v1200_v2  ;;  %922 = vmatpush3.msra.mxu0 %v280_v1 }
  0x52   : > { %924 = vmatmul.mubr.msk.f32.vlgmr.msra.gmra.mxu0 %vm282_vm3, %v1202_v3  ;;  %v281_v8 = vld [vmem:[#allocation2] sm:$0x1] }
  0x53   : > { %v360_v12 = vld [vmem:[#allocation3 + $0x8] sm:$0xff]  ;;  %v359_v14 = vld [vmem:[#allocation3] sm:$0xff] }
  0x54   : > { %v362_v18 = vld [vmem:[#allocation3 + $0x18] sm:$0xff]  ;;  %v361_v20 = vld [vmem:[#allocation3 + $0x10] sm:$0xff] }
  0xcb   : > { %v379_v4 = vpop.trf.xlu0 }
  0xcc   : > { %928 = vmatprep.mubr.msk.f32.mxu1 %vm282_vm3, %v379_v4 }
  0xcf   : > { %v380_v5 = vpop.trf.xlu0 }
  0xd0   : > { %929 = vmatmul.mubr.msk.f32.vlgmr.msra.gmra.mxu1 %vm282_vm3, %v380_v5 }
  0xd3   : > { %v381_v6 = vpop.trf.xlu0 }
  0xd4   : > { %931 = vmatprep.mubr.msk.f32.mxu1 %vm282_vm3, %v381_v6 }
  0xd7   : > { %v382_v7 = vpop.trf.xlu0 }
  0xd8   : > { %932 = vmatmul.mubr.msk.f32.gmra.mxu1 %vm282_vm3, %v382_v7 }
 0x112   : > { %v352_v9 = vpop.f32.mrf.mxu0 }
 0x113   : > { %v356_v10 = vadd.f32 %v352_v9, %v281_v8 }
 0x114   : > { %v925_v11 = vpop.f32.mrf.mxu0 }
 0x115   : > { %358 = vst.msk [vmem:[#allocation2] sm:$0x1] %vm357_vm4, %v356_v10 }
 0x190   : > { %v930_v13 = vpop.f32.mrf.mxu1 }
 0x191   : > { %v493_v15 = vadd.f32 %v930_v13, %v360_v12 }
 0x192   : > { %v473_v16 = vpop.f32.mrf.mxu1 }
 0x193   : > { %498 = vst.msk [vmem:[#allocation3 + $0x8] sm:$0xff] %vm496_vm5, %v493_v15  ;;  %v492_v17 = vadd.f32 %v473_v16, %v359_v14 }
 0x195   : > { %497 = vst.msk [vmem:[#allocation3] sm:$0xff] %vm496_vm5, %v492_v17 }
 0x198   : > { %v933_v19 = vpop.f32.mrf.mxu1 }
 0x199   : > { %v495_v21 = vadd.f32 %v933_v19, %v362_v18  ;;  %504 = sbr.rel (%p883_p8) target bundleno = 849 (0x351), region = 56 }
 0x19a   : > { %v483_v22 = vpop.f32.mrf.mxu1 }
 0x19b   : > { %500 = vst.msk [vmem:[#allocation3 + $0x18] sm:$0xff] %vm496_vm5, %v495_v21  ;;  %v494_v23 = vadd.f32 %v483_v22, %v361_v20 }
 0x19d   : > { %499 = vst.msk [vmem:[#allocation3 + $0x10] sm:$0xff] %vm496_vm5, %v494_v23 }
 0x19e   : > { %v508_v24 = vld [vmem:[#allocation7 + $0x18] sm:$0xff]  ;;  %v507_v25 = vld [vmem:[#allocation7 + $0x10] sm:$0xff]  ;;  %v1203_v27 = vmov 0.0   ;;  %v506_v28 = vld [vmem:[#allocation7 + $0x8] sm:$0xff]  ;;  %vm1204_vm6 = vmmov 0   ;;  %v1205_v47 = vmov 1.0  }
 0x19f   : > { %945 = vmatprep.subr.mxu1 %v508_v24  ;;  %v511_v26 = vld [vmem:[#allocation3] sm:$0xff]  ;;  %934 = vmatprep.subr.mxu0 %v1203_v27  ;;  %v512_v30 = vld [vmem:[#allocation3 + $0x8] sm:$0xff]  ;;  %v505_v32 = vld [vmem:[#allocation7] sm:$0xff] }
 0x1a0   : > { %946 = vmatpush3.msra.mxu1 %v508_v24  ;;  %v515_v29 = vmul.f32 0.05, %v511_v26  ;;  %935 = vmatpush3.msra.mxu0 %v508_v24  ;;  %v516_v33 = vmul.f32 0.05, %v512_v30  ;;  %v509_v37 = vld [vmem:[#allocation2] sm:$0x1] }
 0x1a1   : > { %947 = vmatprep.subr.mxu1 %v507_v25  ;;  %936 = vmatprep.subr.mxu0 %v1203_v27  ;;  %v510_v38 = vmul.f32 0.05, %v509_v37  ;;  %v592_v56 = vld [vmem:[%s1403_s2] sm:$0x1] }
 0x1a2   : > { %948 = vmatpush3.msra.mxu1 %v507_v25  ;;  %953 = vmatprep.mubr.msk.f32.mxu1 %vm496_vm5, %v515_v29  ;;  %v514_v35 = vld [vmem:[#allocation3 + $0x18] sm:$0xff] }
 0x1a3   : > { %949 = vmatprep.subr.mxu1 %v506_v28  ;;  %937 = vmatpush3.msra.mxu0 %v507_v25  ;;  %v518_v36 = vmul.f32 0.05, %v514_v35  ;;  %v770_v57 = vld [vmem:[%s1404_s3] sm:$0x1] }
 0x1a4   : > { %v513_v31 = vld [vmem:[#allocation3 + $0x10] sm:$0xff]  ;;  %950 = vmatpush3.msra.mxu1 %v506_v28  ;;  %938 = vmatprep.subr.mxu0 %v1203_v27  ;;  %v775_v61 = vld [vmem:[%s1405_s4] sm:$0x1] }
 0x1a5   : > { %v517_v34 = vmul.f32 0.05, %v513_v31  ;;  %951 = vmatprep.subr.mxu1 %v505_v32  ;;  %939 = vmatpush3.msra.mxu0 %v506_v28 }
 0x1a6   : > { %952 = vmatpush3.msra.mxu1 %v505_v32  ;;  %940 = vmatprep.subr.mxu0 %v1203_v27 }
 0x1a7   : > { %954 = vmatmul.mubr.msk.f32.vlgmr.msra.gmra.mxu1 %vm496_vm5, %v516_v33  ;;  %941 = vmatpush3.msra.mxu0 %v505_v32 }
 0x1a8   : > { %956 = vmatprep.mubr.msk.f32.mxu1 %vm496_vm5, %v517_v34  ;;  %959 = vmatprep.subr.mxu0 %v1203_v27 }
 0x1a9   : > { %942 = vmatprep.mubr.msk.f32.mxu0 %vm1204_vm6, %v1203_v27 }
 0x1aa   : > { %943 = vmatmul.mubr.msk.f32.vlgmr.msra.gmra.mxu0 %vm496_vm5, %v510_v38 }
 0x1ab   : > { %957 = vmatmul.mubr.msk.f32.gmra.mxu1 %vm496_vm5, %v518_v36  ;;  %967 = vmatprep.mubr.msk.f32.mxu0 %vm1204_vm6, %v1203_v27 }
 0x267   : > { %v955_v39 = vpop.f32.mrf.mxu1 }
 0x268   : > { %v692_v45 = vmul.f32 %v955_v39, %v506_v28 }
 0x269   : > { %v672_v40 = vpop.f32.mrf.mxu1 }
 0x26a   : > { %v691_v46 = vmul.f32 %v672_v40, %v505_v32  ;;  %v588_v48 = vpop.f32.mrf.mxu0 }
 0x26b   : > { %v958_v41 = vpop.f32.mrf.mxu1  ;;  %v767_v50 = vmul.f32 %v588_v48, %v588_v48  ;;  %v593_v59 = vadd.f32 %v592_v56, %v588_v48 }
 0x26c   : > { %v694_v42 = vmul.f32 %v958_v41, %v508_v24  ;;  %v944_v49 = vpop.f32.mrf.mxu0 }
 0x26d   : > { %v682_v43 = vpop.f32.mrf.mxu1 }
 0x26e   : > { %v693_v44 = vmul.f32 %v682_v43, %v507_v25  ;;  %960 = vmatpush3.msra.mxu0 %v694_v42 }
 0x26f   : > { %961 = vmatprep.subr.mxu0 %v1203_v27 }
 0x270   : > { %962 = vmatpush3.msra.mxu0 %v693_v44 }
 0x271   : > { %963 = vmatprep.subr.mxu0 %v1203_v27 }
 0x272   : > { %964 = vmatpush3.msra.mxu0 %v692_v45 }
 0x273   : > { %965 = vmatprep.subr.mxu0 %v1203_v27 }
 0x274   : > { %966 = vmatpush3.msra.mxu0 %v691_v46 }
 0x275   : > { %968 = vmatmul.mubr.msk.f32.vlgmr.msra.gmra.mxu0 %vm496_vm5, %v1205_v47 }
 0x335   : > { %v763_v51 = vpop.f32.mrf.mxu0 }
 0x336   : > { %v768_v52 = vsub.f32 %v763_v51, %v767_v50 }
 0x337   : > { %v969_v53 = vpop.f32.mrf.mxu0 }
 0x338   : > { %v769_v54 = vmax.f32 %v768_v52, 0.0 }
 0x33a   : > { %v771_v55 = vadd.f32 1e-05, %v769_v54 }
 0x33c   : > { %1043 = vrsqrt.f32 %v771_v55 }
 0x349   : > { %v1044_v58 = vpop.eup %1043 }
 0x34a   : > { %v773_v60 = vmul.f32 %v1044_v58, %v770_v57 }
 0x34c   : > { %774 = vst [vmem:[#allocation9] sm:$0x1] %v773_v60  ;;  %v776_v62 = vmul.f32 %v773_v60, %v593_v59 }
 0x34e   : > { %v777_v63 = vsub.f32 %v775_v61, %v776_v62 }
 0x350   : > { %778 = vst [vmem:[#allocation10] sm:$0x1] %v777_v63 }
 0x351 PF: > { %p995_p0 = scmp.eq.s32.totalorder %s1262_s25, 2  ;;  %s1206_s24 = smov [#allocation9]  }
 0x352   : > { %s786_s10 = sshll.u32 %s1206_s24, 4  ;;  %s1207_s11 = smov [#allocation10]   ;;  %s787_s10 = int_to_ptr.vmem [resolvable:$true] %s786_s10 }
 0x353   : > { %s797_s12 = sshll.u32 %s1207_s11, 4  ;;  %s1099_s13 = scalar_lea.vmem %s787_s10, 16  ;;  %s798_s12 = int_to_ptr.vmem [resolvable:$true] %s797_s12 }
 0x354   : > { %p1100_p7 = scmp.ne.s32.totalorder %s787_s10, %s1099_s13  ;;  %s1105_s14 = scalar_lea.vmem %s787_s10, 32 }
 0x355   : > { %p1106_p11 = scmp.lt.s32.totalorder %s787_s10, %s787_s10  ;;  %p1107_p12 = scmp.lt.s32.totalorder %s1105_s14, %s1099_s13 }
 0x356   : > { %p1101_p9 = pnand %p1100_p7, %p995_p0 }
 0x357   : > { %p1108_p13 = por %p1107_p12, %p1106_p11 }
 0x358   : > { %p1102_p10 = pneg %p1101_p9 }
 0x35a   : > { %p1109_p2 = pnand %p1108_p13, %p1102_p10 }
 0x35c   : > { %1112 = shalt.err (!%p1109_p2)
}
 0x35d   : > { %977 = dma.vmem_to_hbm [thread:$0]  (%p995_p0), %s787_s10, 16, %s1406_s5, [#allocation6]  }
 0x35e   : > { %s1123_s18 = scalar_lea.vmem %s798_s12, 16  ;;  %s1129_s19 = scalar_lea.vmem %s798_s12, 32 }
 0x35f   : > { %p1124_p3 = scmp.ne.s32.totalorder %s798_s12, %s1123_s18  ;;  %p1130_p5 = scmp.lt.s32.totalorder %s798_s12, %s798_s12 }
 0x360   : > { %p1131_p6 = scmp.lt.s32.totalorder %s1129_s19, %s1123_s18 }
 0x361   : > { %p1125_p4 = pnand %p1124_p3, %p995_p0 }
 0x362   : > { %p1132_p8 = por %p1131_p6, %p1130_p5 }
 0x363   : > { %p1126_p1 = pneg %p1125_p4 }
 0x365   : > { %p1133_p7 = pnand %p1132_p8, %p1126_p1 }
 0x367   : > { %1136 = shalt.err (!%p1133_p7)
}
 0x368   : > { %979 = dma.vmem_to_hbm [thread:$0]  (%p995_p0), %s798_s12, 16, %s1407_s6, [#allocation11]  }
 0x369   : > { %1172 = dma.done.wait (%p995_p0), [#allocation6], 16  }
 0x36a   : > { %1174 = vsyncadd (%p995_p0), [#allocation6], 4294967280 }
 0x36b   : > { %1176 = dma.done.wait (%p995_p0), [#allocation11], 16  }
 0x36c   : > { %1178 = vsyncadd (%p995_p0), [#allocation11], 4294967280 }
 0x36d PF: > { %p20_p9 = scmp.ge.s32.totalorder %s1288_s7, 5   ;;  %s1420_s21 = smov %s1185_s22 }
 0x36e   : > { %s1421_s22 = smov %s1189_s23  ;;  %s1422_s23 = smov %s1305_s15 }
 0x36f   : > { %s1423_s24 = smov %s1288_s7  ;;  %22 = sbr.rel (!%p20_p9) target bundleno = 6 (0x6), region = 97 }
 0x374   :  { %814 = vsyncpa [#allocation5], 1 }
 0x375   :  { %816 = vsyncpa [#allocation5 + $0x1], 1 }
 0x376   :  { %817 = vsyncpa [#allocation8], 1 }
 0x377   :  { %818 = vsyncpa [#allocation6], 1 }
 0x378   :  { %820 = vsyncpa [#allocation6 + $0x1], 1 }
 0x379   :  { %821 = vsyncpa [#allocation11], 1 }

</bundles_post_ra>
